<compile_context>
chip_gen: v7x
topology: tpu7x:2x2x1
jax: 0.10.0
libtpu: 0.0.40
codegen_flags: <defaults>
</compile_context>

<pallas_src>
import jax
import jax.numpy as jnp
from jax import lax
from jax.experimental import pallas as pl
from jax.experimental.pallas import tpu as pltpu

NUM_TABLES = 10
EMB_DIM = 3
NUM_EMB = 32            # vocab size V
B = 2                   # batch
S = 8                   # sequence length
OUT_ROWS = 8 * S + 2    # 8 full tables of S rows + 2 single summed rows = 66
FUSED_COLS = NUM_TABLES * EMB_DIM   # 30


def embedding_sum_kernel(idx_ref, w_ref, out_ref):
    # idx_ref: (B, S)        int32   VMEM
    # w_ref:   (V, 30)       float32 VMEM   (fused tables: cols 3t..3t+2 = table t)
    # out_ref: (S + 1, 30)   float32 VMEM
    #          rows 0..S-1 : sum over batch of table_t[idx[:, s]] for every table
    #          row  S      : additional sum over the S rows (seq-dim sum per table)
    V = w_ref.shape[0]

    # Batch-summed one-hot built in 2-D: oh_sum[s, v] = #{b : idx[b, s] == v}.
    # Per-batch boolean compare against an (S, V) iota, accumulated with a
    # tiny unrolled add — no (B, S, V) intermediate.
    iota_v = lax.broadcasted_iota(jnp.int32, (S, V), 1)          # (S, V)
    idx = idx_ref[...]                                           # (B, S)
    oh_sum = (idx[0][:, None] == iota_v).astype(jnp.float32)     # (S, V)
    for b in range(1, B):
        oh_sum = oh_sum + (idx[b][:, None] == iota_v).astype(jnp.float32)

    # Single fused MXU matmul: all 10 tables gathered + batch-summed at once.
    # Deliberately NOT padded toward MXU-native shapes (launch-bound, not MXU-bound).
    sb = jnp.dot(oh_sum, w_ref[...],
                 preferred_element_type=jnp.float32)             # (S, 30)

    # Rows 0..S-1: per-position results; row S: seq-dim sums (only cols 9:12
    # are consumed but computing all 30 is free).
    out_ref[0:S, :] = sb
    out_ref[S:S + 1, :] = jnp.sum(sb, axis=0, keepdims=True)


def fuse_tables(tables):
    """One-time parameter-layout transform: (NUM_TABLES, V, 3) -> (V, 30).

    Hoisted out of the per-call path per the performance review; W[:, 3t:3t+3]
    == tables[t].
    """
    V = tables.shape[1]
    return jnp.transpose(tables, (1, 0, 2)).reshape(V, FUSED_COLS)


@jax.jit
def embedding_sum_forward(indices, w_fused):
    """indices: (B, S) int32; w_fused: (V, 30) float32 -> (8*S+2, 3)."""
    res = pl.pallas_call(
        embedding_sum_kernel,
        out_shape=jax.ShapeDtypeStruct((S + 1, FUSED_COLS), jnp.float32),
        in_specs=[
            pl.BlockSpec(memory_space=pltpu.MemorySpace.VMEM),
            pl.BlockSpec(memory_space=pltpu.MemorySpace.VMEM),
        ],
        out_specs=pl.BlockSpec(memory_space=pltpu.MemorySpace.VMEM),
    )(indices, w_fused)

    # Pure layout unpacking (fused into the same jitted program): slice the
    # per-table 3-wide column blocks and concatenate in torch.cat order.
    sb = res[:S]                                                 # (S, 30)
    sum3 = res[S:S + 1, 3 * EMB_DIM:4 * EMB_DIM]                 # (1, 3) = seq sum of table 3
    blocks = [sb[:, 3 * t:3 * t + EMB_DIM] for t in range(NUM_TABLES)]
    blocks[3] = sum3
    blocks[5] = sum3   # outs[5] = sum(outs[3], dim=1) after outs[3] was replaced -> identical
    return jnp.concatenate(blocks, axis=0)                       # (8*S + 2, 3)


def reference_forward(indices, tables):
    """Pure-JAX reference mirroring the PyTorch module exactly."""
    outs = [tables[t][indices] for t in range(NUM_TABLES)]       # (B, S, 3) each
    outs[3] = jnp.sum(outs[3], axis=1, keepdims=True)            # (B, 1, 3)
    outs[5] = jnp.sum(outs[3], axis=1, keepdims=True)            # (B, 1, 3)
    return jnp.sum(jnp.concatenate(outs, axis=1), axis=0)        # (8S+2, 3)


if __name__ == "__main__":
    key = jax.random.PRNGKey(0)
    k_tbl, k_idx = jax.random.split(key)

    # Deterministic parameter init (10 embedding tables of shape (V, 3)).
    tables = jax.random.normal(k_tbl, (NUM_TABLES, NUM_EMB, EMB_DIM),
                               dtype=jnp.float32)
    indices = jax.random.randint(k_idx, (B, S), 0, NUM_EMB, dtype=jnp.int32)

    # Parameter-init-time fusion (done once, outside the jitted forward).
    w_fused = jax.block_until_ready(fuse_tables(tables))

    out = jax.block_until_ready(embedding_sum_forward(indices, w_fused))

    ref = reference_forward(indices, tables)
    assert out.shape == (OUT_ROWS, EMB_DIM), out.shape
    assert jnp.allclose(out, ref, atol=1e-5, rtol=1e-5), (
        "Pallas kernel output does not match reference")

    print("KERNEL_OK")
</pallas_src>

<mosaic_0001>
module attributes {stable_mosaic.version = 11 : i64} {
  func.func @embedding_sum_kernel(%arg0: memref<2x8xi32, #tpu.memory_space<vmem>>, %arg1: memref<32x30xf32, #tpu.memory_space<vmem>>, %arg2: memref<9x30xf32, #tpu.memory_space<vmem>>) attributes {dimension_semantics = [], scalar_prefetch = 0 : i64, scratch_operands = 0 : i64, tpu.core_type = #tpu.core_type<tc>} {
    %0 = tpu.iota {dimensions = array<i32: 1>} : vector<8x32xi32>
    %c0 = arith.constant 0 : index
    %c0_0 = arith.constant 0 : index
    %1 = vector.load %arg0[%c0, %c0_0] : memref<2x8xi32, #tpu.memory_space<vmem>>, vector<2x8xi32>
    %2 = vector.extract_strided_slice %1 {offsets = [0, 0], sizes = [1, 8], strides = [1, 1]} : vector<2x8xi32> to vector<1x8xi32>
    %3 = vector.shape_cast %2 : vector<1x8xi32> to vector<8xi32>
    %4 = vector.shape_cast %3 : vector<8xi32> to vector<8x1xi32>
    %5 = vector.broadcast %4 : vector<8x1xi32> to vector<8x32xi32>
    %6 = arith.cmpi eq, %5, %0 : vector<8x32xi32>
    %7 = arith.extui %6 : vector<8x32xi1> to vector<8x32xi32>
    %8 = arith.sitofp %7 : vector<8x32xi32> to vector<8x32xf32>
    %9 = vector.extract_strided_slice %1 {offsets = [1, 0], sizes = [1, 8], strides = [1, 1]} : vector<2x8xi32> to vector<1x8xi32>
    %10 = vector.shape_cast %9 : vector<1x8xi32> to vector<8xi32>
    %11 = vector.shape_cast %10 : vector<8xi32> to vector<8x1xi32>
    %12 = vector.broadcast %11 : vector<8x1xi32> to vector<8x32xi32>
    %13 = arith.cmpi eq, %12, %0 : vector<8x32xi32>
    %14 = arith.extui %13 : vector<8x32xi1> to vector<8x32xi32>
    %15 = arith.sitofp %14 : vector<8x32xi32> to vector<8x32xf32>
    %16 = arith.addf %8, %15 : vector<8x32xf32>
    %c0_1 = arith.constant 0 : index
    %c0_2 = arith.constant 0 : index
    %17 = vector.load %arg1[%c0_1, %c0_2] : memref<32x30xf32, #tpu.memory_space<vmem>>, vector<32x30xf32>
    %cst = arith.constant dense<0.000000e+00> : vector<8x30xf32>
    %18 = tpu.matmul %16, %17, %cst {dimension_numbers = #tpu.dot_dimension_numbers<[1], [0], [0], [1], [0, 0, 1, 1], [], []>} : vector<8x32xf32>, vector<32x30xf32>, vector<8x30xf32> -> vector<8x30xf32>
    %c0_3 = arith.constant 0 : index
    %c0_4 = arith.constant 0 : index
    %19 = vector.load %arg2[%c0_3, %c0_4] : memref<9x30xf32, #tpu.memory_space<vmem>>, vector<8x30xf32>
    tpu.vector_store %arg2[%c0_3, %c0_4], %18 {strides = array<i32>} : memref<9x30xf32, #tpu.memory_space<vmem>>, vector<8x30xf32>,
    %cst_5 = arith.constant dense<0.000000e+00> : vector<30xf32>
    %20 = vector.multi_reduction <add>, %18, %cst_5 [0] : vector<8x30xf32> to vector<30xf32>
    %21 = vector.shape_cast %20 : vector<30xf32> to vector<1x30xf32>
    %c8 = arith.constant 8 : index
    %c0_6 = arith.constant 0 : index
    %22 = vector.load %arg2[%c8, %c0_6] : memref<9x30xf32, #tpu.memory_space<vmem>>, vector<1x30xf32>
    tpu.vector_store %arg2[%c8, %c0_6], %21 {strides = array<i32>} : memref<9x30xf32, #tpu.memory_space<vmem>>, vector<1x30xf32>,
    return
  }
}

</mosaic_0001>

<bundles_post_ra>
// kernel: embedding_sum_forward.1
= control target key start
LH: loop header
LB: loop body
LE: loop exit
PB: predicated region body
PF: predicated region fallthrough
CT: control target
= control target key end

     0   :  { %7 = vsyncpa [#allocation3], 0  ;;  %s295_s0 = inlined_call_operand.hbm [shape: s32[2,8], index: 0, kind: input, shape index: {}]   ;;  %s296_s1 = inlined_call_operand.hbm [shape: f32[32,30], index: 1, kind: input, shape index: {}]   ;;  %s297_s2 = inlined_call_operand.vmem [shape: f32[9,30], index: 2, kind: output, shape index: {}]  }
   0x1   :  { %8 = vsyncpa [#allocation5], 0  ;;  %s236_s9 = smov [#allocation2]   ;;  %s237_s11 = smov [#allocation4]  }
   0x2   :  { %s15_s10 = sshll.u32 %s236_s9, 4  ;;  %s24_s12 = sshll.u32 %s237_s11, 4  ;;  %s16_s10 = int_to_ptr.vmem [resolvable:$true] %s15_s10  ;;  %s258_s12 = int_to_ptr.vmem [resolvable:$true] %s24_s12 }
   0x3   :  { %s188_s15 = scalar_lea.hbm %s295_s0, 32 }
   0x4   :  { %p189_p0 = scmp.ne.s32.totalorder %s295_s0, %s188_s15  ;;  %p192_p1 = scmp.lt.u32.totalorder %s188_s15, %s295_s0 }
   0x6   :  { %p194_p2 = pnand %p192_p1, %p189_p0 }
   0x8   :  { %197 = shalt.err (!%p194_p2)
}
   0x9   :  { %s198_s20 = scalar_lea.vmem %s16_s10, 32  ;;  %p203_p4 = scmp.lt.s32.totalorder %s16_s10, %s16_s10 }
   0xa   :  { %p199_p3 = scmp.ne.s32.totalorder %s16_s10, %s198_s20  ;;  %p204_p5 = scmp.lt.s32.totalorder %s198_s20, %s198_s20 }
   0xc   :  { %p205_p6 = por %p204_p5, %p203_p4 }
   0xe   :  { %p206_p7 = pnand %p205_p6, %p199_p3 }
  0x10   :  { %209 = shalt.err (!%p206_p7)
}
  0x11   :  { %18 = dma.hbm_to_vmem [thread:$0]  %s295_s0, 32, %s16_s10, [#allocation3]  }
  0x12   :  { %s210_s25 = scalar_lea.hbm %s296_s1, 512 }
  0x13   :  { %p211_p8 = scmp.ne.s32.totalorder %s296_s1, %s210_s25  ;;  %p214_p9 = scmp.lt.u32.totalorder %s210_s25, %s296_s1 }
  0x15   :  { %p216_p10 = pnand %p214_p9, %p211_p8 }
  0x17   :  { %219 = shalt.err (!%p216_p10)
}
  0x18   :  { %s220_s30 = scalar_lea.vmem %s258_s12, 512  ;;  %p225_p12 = scmp.lt.s32.totalorder %s258_s12, %s258_s12 }
  0x19   :  { %p221_p11 = scmp.ne.s32.totalorder %s258_s12, %s220_s30  ;;  %p226_p13 = scmp.lt.s32.totalorder %s220_s30, %s220_s30 }
  0x1b   :  { %p227_p0 = por %p226_p13, %p225_p12 }
  0x1d   :  { %p228_p1 = pnand %p227_p0, %p221_p11 }
  0x1f   :  { %231 = shalt.err (!%p228_p1)
}
  0x20   :  { %s238_s0 = smov 128   ;;  %s239_s3 = smov 8  }
  0x21   :  { %30 = dma.hbm_to_vmem [thread:$0]  %s296_s1, 512, %s258_s12, [#allocation5], %s238_s0, %s238_s0, %s239_s3  }
  0x22   :  { %232 = dma.done.wait [#allocation3], 32  }
  0x23   :  { %233 = vsyncadd [#allocation3], 4294967264 }
  0x24   :  { %234 = dma.done.wait [#allocation5], 512  }
  0x25   :  { %235 = vsyncadd [#allocation5], 4294966784  ;;  %v37_v0 = vlaneseq  ;;  %v240_v1 = vmov 0.0|0.0   ;;  %vm241_vm0 = vmmov 0   ;;  %v242_v4 = vmov 0.0   ;;  %v61_v7 = vld [vmem:[#allocation4] sm:$0xff] }
  0x26   :  { %175 = vmatprep.subr.bf16.mxu0 %v240_v1  ;;  %172 = vmatprep.mubr.msk.f32.mxu0 %vm241_vm0, %v242_v4  ;;  %v39_v6 = vld [vmem:[#allocation2] sm:$0x3]  ;;  %v62_v8 = vld [vmem:[#allocation4 + $0x8] sm:$0xff]  ;;  %v63_v11 = vld [vmem:[#allocation4 + $0x10] sm:$0xff]  ;;  %vm65_vm3 = vcmask 261120   ;;  %vm139_vm4 = vcmask 244736  }
  0x27   :  { %v41_v2 = vshrl.u32 %v37_v0, 7  ;;  %v176_v10 = vpack.c.bf16 %v62_v8, %v61_v7  ;;  %v64_v12 = vld [vmem:[#allocation4 + $0x18] sm:$0xff]  ;;  %v38_v15 = vand.u32 127, %v37_v0  ;;  %vm148_vm5 = vcmask 237568  }
  0x28   :  { %v179_v14 = vpack.c.bf16 %v64_v12, %v63_v11 }
  0x29   :  { %v42_v3 = vsub.s32 0, %v41_v2  ;;  %v52_v5 = vsub.s32 1, %v41_v2  ;;  %177 = vmatpush3.bf16.msra.mxu0 %v176_v10 }
  0x2a   :  { %178 = vmatprep.subr.bf16.mxu0 %v240_v1 }
  0x2b   :  { %v43_v9 = vrot.slane %v39_v6, %v42_v3  ;;  %v53_v13 = vrot.slane %v39_v6, %v52_v5 }
  0x2d   :  { %45 = vbcast.lane.b32.xlu0 %v43_v9, 256  ;;  %180 = vmatpush3.bf16.msra.mxu0 %v179_v14 }
  0x31   :  { %55 = vbcast.lane.b32.xlu0 %v53_v13, 256 }
  0x9f   :  { %v46_v16 = vpop.permute.xlu0 %45 }
  0xa0   :  { %vm47_vm1 = vcmp.eq.s32.totalorder %v46_v16, %v38_v15 }
  0xa1   :  { %v156_v18 = vsel %vm47_vm1, 1.0, %v242_v4 }
  0xa3   :  { %v56_v17 = vpop.permute.xlu0 %55 }
  0xa4   :  { %vm57_vm2 = vcmp.eq.s32.totalorder %v56_v17, %v38_v15 }
  0xa5   :  { %v157_v19 = vsel %vm57_vm2, 1.0, %v242_v4 }
  0xa6   :  { %v60_v20 = vadd.f32 %v157_v19, %v156_v18 }
  0xa8   :  { %173 = vmatmul.mubr.msk.f32.vlgmr.msra.gmra.mrb[0].mxu0 %vm65_vm3, %v60_v20 }
 0x17b   :  { %v135_v21 = vpop.f32.mrb[0].mxu0 }
 0x17c   :  { %140 = vst.msk [vmem:[%s297_s2] sm:$0xff] %vm139_vm4, %v135_v21  ;;  %v141_v22 = vsel %vm139_vm4, %v135_v21, 0.0  ;;  %v174_v23 = vpop.f32.mrb[1].mxu0 }
 0x17d   :  { %v142_v24 = vrot.slane %v141_v22, 4 }
 0x17f   :  { %v143_v25 = vadd.f32 %v142_v24, %v141_v22 }
 0x181   :  { %v144_v26 = vrot.slane %v143_v25, 2 }
 0x183   :  { %v145_v27 = vadd.f32 %v144_v26, %v143_v25 }
 0x185   :  { %v146_v28 = vrot.slane %v145_v27, 1 }
 0x187   :  { %v147_v29 = vadd.f32 %v146_v28, %v145_v27 }
 0x189   :  { %149 = vst.msk [vmem:[%s297_s2 + $0x8] sm:$0x1] %vm148_vm5, %v147_v29 }
 0x18a   :  { %154 = vsyncpa [#allocation3], 1 }
 0x18b   :  { %155 = vsyncpa [#allocation5], 1 }

</bundles_post_ra>
